<compile_context>
chip_gen: v7x
topology: tpu7x:2x2x1
jax: 0.10.0
libtpu: 0.0.40
codegen_flags: <defaults>
</compile_context>

<pallas_src>
import jax
import jax.numpy as jnp
import numpy as np
from jax import lax
from jax.experimental import pallas as pl
from jax.experimental.pallas import tpu as pltpu


def _round_up(x, m):
    return (x + m - 1) // m * m


def _conv_kernel(x_ref, w_ref, b_ref, o_ref):
    # w_ref: (Cout, KP)  bf16  flattened 3x3 weights (resident)
    # x_ref: (KP, TN)    bf16  transposed im2col column-tile (lane-dense)
    # b_ref: (Cout, 1)   f32   bias (resident; lane-broadcast in-kernel)
    # o_ref: (Cout, TN)  bf16  dense output tile — every lane is a real value
    acc = jnp.dot(w_ref[...], x_ref[...], preferred_element_type=jnp.float32)
    o_ref[...] = (acc + b_ref[...]).astype(o_ref.dtype)


def _make_conv_call(cout, kp, cols_p, tn):
    grid_len = cols_p // tn
    # v7x note: only shard across both TensorCores when each core gets >= 2
    # steps to double-buffer; at grid=(1,) run a single step on one core.
    semantics = ("parallel",) if grid_len >= 4 else ("arbitrary",)
    cost = pl.CostEstimate(
        flops=2 * cout * kp * cols_p,
        transcendentals=0,
        bytes_accessed=(kp * cols_p * 2      # bf16 im2col^T read
                        + cout * kp * 2      # bf16 weights read
                        + cout * 4           # f32 bias read
                        + cout * cols_p * 2  # bf16 output write
                        ),
    )
    return pl.pallas_call(
        _conv_kernel,
        out_shape=jax.ShapeDtypeStruct((cout, cols_p), jnp.bfloat16),
        grid=(grid_len,),
        in_specs=[
            pl.BlockSpec((kp, tn), lambda i: (0, i)),    # im2col^T column tile
            pl.BlockSpec((cout, kp), lambda i: (0, 0)),  # weights, resident
            pl.BlockSpec((cout, 1), lambda i: (0, 0)),   # bias, resident
        ],
        out_specs=pl.BlockSpec((cout, tn), lambda i: (0, i)),
        compiler_params=pltpu.CompilerParams(
            dimension_semantics=semantics,
            vmem_limit_bytes=32 * 1024 * 1024,  # far above need; safe on v7x 64 MiB
        ),
        cost_estimate=cost,
    )


@jax.jit
def debug_net_forward(x_nchw, weight_oihw, bias):
    """DebugNet.forward(x) == net(x) with net = Conv2d(C, C, (3,3), padding=1)."""
    B, Cin, H, W = x_nchw.shape
    Cout = weight_oihw.shape[0]
    K = 9 * Cin
    KP = _round_up(K, 16)          # small pad 36->48 (bf16 sublane packing), NOT 128

    cols = B * H * W
    if cols <= 1024:
        tn = _round_up(cols, 128)  # single grid step: per-step overhead dominates here
    else:
        tn = 512                   # 512-wide lane tiles when the problem scales up
    cols_p = _round_up(cols, tn)

    # ---- wrapper glue (cheap XLA): spatial pad + transposed im2col ----------
    # bf16 early so the glue moves half the bytes.
    x_pad = jnp.pad(x_nchw.astype(jnp.bfloat16),
                    ((0, 0), (0, 0), (1, 1), (1, 1)))          # (B, Cin, H+2, W+2)
    taps = [x_pad[:, :, dy:dy + H, dx:dx + W]                   # 9 x (B, Cin, H, W)
            for dy in range(3) for dx in range(3)]
    # (9, B, Cin, H, W) -> (9, Cin, B, H, W) -> (K, B*H*W): k = tap*Cin + ci,
    # columns flattened as (b, h, w).  Fully lane-dense, no K=128 padding.
    x2dT = jnp.stack(taps, axis=0).transpose(0, 2, 1, 3, 4).reshape(K, cols)
    x2dT = jnp.pad(x2dT, ((0, KP - K), (0, cols_p - cols)))     # explicit zero pad

    # OIHW -> (Cout, dy, dx, Cin) -> (Cout, 9*Cin): matches tap-major/channel-minor k.
    w2dT = jnp.transpose(weight_oihw, (0, 2, 3, 1)).reshape(Cout, K)
    w2dT = jnp.pad(w2dT, ((0, 0), (0, KP - K))).astype(jnp.bfloat16)
    b2d = bias.reshape(Cout, 1).astype(jnp.float32)

    out_t = _make_conv_call(Cout, KP, cols_p, tn)(x2dT, w2dT, b2d)  # (Cout, cols_p) bf16

    # ---- glue back: drop padding, (Cout, B*H*W) -> NCHW (PyTorch convention).
    out = out_t[:, :cols].reshape(Cout, B, H, W).transpose(1, 0, 2, 3)
    return out.astype(jnp.float32)   # dtype contract of the f32 Conv2d; values carry bf16 rounding


if __name__ == "__main__":
    B, C, H, W = 2, 4, 16, 16

    key = jax.random.PRNGKey(0)
    kx, kw, kb = jax.random.split(key, 3)

    x = jax.random.normal(kx, (B, C, H, W), dtype=jnp.float32)
    # Deterministic synthetic parameters (Conv2d(C, C, 3x3) shapes / init scale).
    fan_in = C * 3 * 3
    bound = 1.0 / np.sqrt(fan_in)
    weight = jax.random.uniform(kw, (C, C, 3, 3), jnp.float32, -bound, bound)
    bias = jax.random.uniform(kb, (C,), jnp.float32, -bound, bound)

    out = jax.block_until_ready(debug_net_forward(x, weight, bias))

    # Reference 1: same precision recipe (bf16 operands, f32 accumulate); the
    # only extra error in the kernel is the bf16 output rounding (<= 2^-8 rel).
    ref_bf16 = lax.conv_general_dilated(
        x.astype(jnp.bfloat16), weight.astype(jnp.bfloat16),
        window_strides=(1, 1), padding="SAME",
        dimension_numbers=("NCHW", "OIHW", "NCHW"),
        preferred_element_type=jnp.float32) + bias.reshape(1, C, 1, 1)
    np.testing.assert_allclose(np.asarray(out), np.asarray(ref_bf16),
                               rtol=8e-3, atol=8e-3)

    # Reference 2: full-f32 torch Conv2d semantics (looser tolerance: bf16
    # operands on the MXU + bf16 output store — the stated precision contract).
    ref_f32 = lax.conv_general_dilated(
        x, weight, window_strides=(1, 1), padding="SAME",
        dimension_numbers=("NCHW", "OIHW", "NCHW")) + bias.reshape(1, C, 1, 1)
    np.testing.assert_allclose(np.asarray(out), np.asarray(ref_f32),
                               rtol=2e-2, atol=2e-2)

    print("KERNEL_OK")
</pallas_src>

<mosaic_0001>
module attributes {stable_mosaic.version = 11 : i64} {
  func.func @_conv_kernel(%arg0: i32, %arg1: memref<48x512xbf16, #tpu.memory_space<vmem>>, %arg2: memref<4x48xbf16, #tpu.memory_space<vmem>>, %arg3: memref<4x1xf32, #tpu.memory_space<vmem>>, %arg4: memref<4x512xbf16, #tpu.memory_space<vmem>>) attributes {dimension_semantics = [#tpu.dimension_semantics<arbitrary>], iteration_bounds = array<i64: 1>, scalar_prefetch = 0 : i64, scratch_operands = 0 : i64, tpu.core_type = #tpu.core_type<tc>, window_params = [{transform_indices = @transform_0, window_bounds = array<i64: 48, 512>}, {pipeline_mode = #tpu.pipeline_mode<synchronous>, transform_indices = @transform_1, window_bounds = array<i64: 4, 48>}, {pipeline_mode = #tpu.pipeline_mode<synchronous>, transform_indices = @transform_2, window_bounds = array<i64: 4, 1>}, {transform_indices = @transform_3, window_bounds = array<i64: 4, 512>}]} {
    %c0 = arith.constant 0 : index
    %c0_0 = arith.constant 0 : index
    %0 = vector.load %arg2[%c0, %c0_0] : memref<4x48xbf16, #tpu.memory_space<vmem>>, vector<4x48xbf16>
    %c0_1 = arith.constant 0 : index
    %c0_2 = arith.constant 0 : index
    %1 = vector.load %arg1[%c0_1, %c0_2] : memref<48x512xbf16, #tpu.memory_space<vmem>>, vector<48x512xbf16>
    %cst = arith.constant dense<0.000000e+00> : vector<4x512xf32>
    %2 = tpu.matmul %0, %1, %cst {dimension_numbers = #tpu.dot_dimension_numbers<[1], [0], [0], [1], [0, 0, 1, 1], [], []>} : vector<4x48xbf16>, vector<48x512xbf16>, vector<4x512xf32> -> vector<4x512xf32>
    %c0_3 = arith.constant 0 : index
    %c0_4 = arith.constant 0 : index
    %3 = vector.load %arg3[%c0_3, %c0_4] : memref<4x1xf32, #tpu.memory_space<vmem>>, vector<4x1xf32>
    %4 = vector.broadcast %3 : vector<4x1xf32> to vector<4x512xf32>
    %5 = arith.addf %2, %4 : vector<4x512xf32>
    %6 = arith.truncf %5 : vector<4x512xf32> to vector<4x512xbf16>
    %c0_5 = arith.constant 0 : index
    %c0_6 = arith.constant 0 : index
    %7 = vector.load %arg4[%c0_5, %c0_6] : memref<4x512xbf16, #tpu.memory_space<vmem>>, vector<4x512xbf16>
    tpu.vector_store %arg4[%c0_5, %c0_6], %6 {strides = array<i32>} : memref<4x512xbf16, #tpu.memory_space<vmem>>, vector<4x512xbf16>,
    return
  }
  func.func @transform_0(%arg0: i32) -> (i32, i32) {
    %c0_i32 = arith.constant 0 : i32
    %c0_i32_0 = arith.constant 0 : i32
    return %c0_i32, %arg0 : i32, i32
  }
  func.func @transform_1(%arg0: i32) -> (i32, i32) {
    %c0_i32 = arith.constant 0 : i32
    %c0_i32_0 = arith.constant 0 : i32
    %c0_i32_1 = arith.constant 0 : i32
    return %c0_i32, %c0_i32_0 : i32, i32
  }
  func.func @transform_2(%arg0: i32) -> (i32, i32) {
    %c0_i32 = arith.constant 0 : i32
    %c0_i32_0 = arith.constant 0 : i32
    %c0_i32_1 = arith.constant 0 : i32
    return %c0_i32, %c0_i32_0 : i32, i32
  }
  func.func @transform_3(%arg0: i32) -> (i32, i32) {
    %c0_i32 = arith.constant 0 : i32
    %c0_i32_0 = arith.constant 0 : i32
    return %c0_i32, %arg0 : i32, i32
  }
}

</mosaic_0001>

<bundles_post_ra>
// kernel: debug_net_forward.1
= control target key start
LH: loop header
LB: loop body
LE: loop exit
PB: predicated region body
PF: predicated region fallthrough
CT: control target
= control target key end

     0   :  { %v248_v1 = vmov 0   ;;  %vm94_vm0 = vcmask 392192   ;;  %v249_v15 = vmov 1983009808   ;;  %v193_v17 = vlaneseq  ;;  %s315_s0 = inlined_call_operand.vmem [shape: bf16[48,512], index: 0, kind: input, shape index: {}]   ;;  %s316_s2 = inlined_call_operand.vmem [shape: f32[4,1], index: 2, kind: input, shape index: {}]   ;;  %s317_s1 = inlined_call_operand.vmem [shape: bf16[4,48], index: 1, kind: input, shape index: {}]   ;;  %s318_s3 = inlined_call_operand.vmem [shape: bf16[4,512], index: 3, kind: output, shape index: {}]  }
   0x1   :  { %v230_v0 = vld [vmem:[%s315_s0 + $0x4] ss:$16 sps:$4 sm:$0xff]   ;;  %130 = vmatprep.mubr.bf16.mxu0 %v248_v1  ;;  %171 = vmatprep.mubr.bf16.mxu1 %v248_v1  ;;  %v232_v2 = vld [vmem:[%s315_s0 + $0xc] ss:$16 sps:$4 sm:$0xff]   ;;  %v234_v3 = vld [vmem:[%s315_s0] ss:$16 sps:$4 sm:$0xff]   ;;  %v191_v16 = vunpack.c.l.s4 %v249_v15 }
   0x2   :  { %229 = vset.pattern.permute.xlu0 %v248_v1  ;;  %98 = vmatprep.subr.bf16.mxu0 %v230_v0  ;;  %v235_v4 = vld [vmem:[%s315_s0 + $0x8] ss:$16 sps:$4 sm:$0xff]   ;;  %v236_v5 = vld [vmem:[%s315_s0 + $0x24] ss:$16 sps:$4 sm:$0xff]   ;;  %v238_v6 = vld [vmem:[%s315_s0 + $0x2c] ss:$16 sps:$4 sm:$0xff]  }
   0x3   :  { %139 = vmatprep.subr.bf16.mxu1 %v232_v2  ;;  %99 = vmatpush1.bf16.msra.mxu0 %v234_v3  ;;  %v240_v7 = vld [vmem:[%s315_s0 + $0x20] ss:$16 sps:$4 sm:$0xff]   ;;  %v241_v8 = vld [vmem:[%s315_s0 + $0x28] ss:$16 sps:$4 sm:$0xff]   ;;  %v242_v9 = vld [vmem:[%s315_s0 + $0x44] ss:$16 sps:$4 sm:$0xff]   ;;  %v192_v19 = vunpack.c.0.s8 %v191_v16 }
   0x4   :  { %140 = vmatpush1.bf16.msra.mxu1 %v235_v4  ;;  %100 = vmatprep.subr.bf16.mxu0 %v236_v5  ;;  %v244_v10 = vld [vmem:[%s315_s0 + $0x4c] ss:$16 sps:$4 sm:$0xff]   ;;  %v246_v11 = vld [vmem:[%s315_s0 + $0x40] ss:$16 sps:$4 sm:$0xff]   ;;  %v247_v12 = vld [vmem:[%s315_s0 + $0x48] ss:$16 sps:$4 sm:$0xff]  }
   0x5   :  { %141 = vmatprep.subr.bf16.mxu1 %v238_v6  ;;  %v28_v13 = vld [vmem:[%s316_s2] sm:$0xf]  ;;  %v194_v20 = vshrl.u32 %v193_v17, 7 }
   0x6   :  { %31 = vperm.xlu0 %229, %v28_v13   ;;  %v15_v14 = vld [vmem:[%s317_s1] sm:$0x3] }
   0x7   :  { %101 = vmatpush1.bf16.msra.mxu0 %v240_v7  ;;  %v195_v28 = vsub.s32 %v192_v19, %v194_v20 }
   0x8   :  { %142 = vmatpush1.bf16.msra.mxu1 %v241_v8  ;;  %102 = vmatprep.subr.bf16.mxu0 %v242_v9 }
   0x9   :  { %143 = vmatprep.subr.bf16.mxu1 %v244_v10 }
   0xb   :  { %103 = vmatpush1.bf16.msra.mxu0 %v246_v11 }
   0xc   :  { %144 = vmatpush1.bf16.msra.mxu1 %v247_v12 }
   0xe   :  { %223 = vmatmul.mubr.msk.bf16.vlgmr.msra.gmra.mrb[0].mxu0 %vm94_vm0, %v15_v14 }
   0xf   :  { %224 = vmatmul.mubr.msk.bf16.vlgmr.msra.gmra.mrb[0].mxu1 %vm94_vm0, %v15_v14 }
  0x85   :  { %v32_v18 = vpop.permute.xlu0 %31 }
  0xe1   :  { %v132_v21 = vpop.f32.mrb[0].mxu0 }
  0xe2   :  { %v173_v22 = vpop.f32.mrb[0].mxu1  ;;  %v133_v23 = vadd.f32 %v132_v21, %v32_v18  ;;  %v134_v25 = vpop.f32.mrb[1].mxu0 }
  0xe3   :  { %v174_v24 = vadd.f32 %v173_v22, %v32_v18  ;;  %v175_v26 = vpop.f32.mrb[1].mxu1  ;;  %v135_v27 = vadd.f32 %v134_v25, %v32_v18  ;;  %v136_v30 = vpop.f32.mrb[2].mxu0 }
  0xe4   :  { %v176_v29 = vadd.f32 %v175_v26, %v32_v18  ;;  %v177_v31 = vpop.f32.mrb[2].mxu1  ;;  %v137_v32 = vpop.f32.mrb[3].mxu0 }
  0xe5   :  { %v178_v33 = vpop.f32.mrb[3].mxu1  ;;  %v225_v34 = vpack.c.bf16 %v135_v27, %v133_v23 }
  0xe6   :  { %v226_v35 = vpack.c.bf16 %v176_v29, %v174_v24 }
  0xe7   :  { %v196_v36 = vrot.slane %v225_v34, %v195_v28 }
  0xe8   :  { %v203_v37 = vrot.slane %v226_v35, %v195_v28 }
  0xea   :  { %v204_v38 = vcombine.low %v196_v36, %v203_v37 }
  0xec   :  { %206 = vst [vmem:[%s318_s3] sm:$0xff] %v204_v38 }

</bundles_post_ra>
